<compile_context>
chip_gen: v6e
topology: v6e:2x2x1
jax: 0.10.0
libtpu: 0.0.40
codegen_flags: <defaults>
</compile_context>

<pallas_src>
import jax
import jax.numpy as jnp
import numpy as np
from jax import lax
from jax.experimental import pallas as pl
from jax.experimental.pallas import tpu as pltpu


def _round_up(a: int, b: int) -> int:
    return (a + b - 1) // b * b


_RESIDENT_X_BUDGET = 40 * 1024 * 1024  # v7x-safe: 64 MiB physical VMEM


def _vmem_limit(footprint_bytes: int) -> int:
    # footprint + headroom, clamped to a v7x-safe range.
    return int(min(max(footprint_bytes + (8 << 20), 24 << 20), 48 << 20))


# ---------------------------------------------------------------------------
# Prepass: per-row argmax of the raw weight, tiled over in_features.
# Running max is carried in VMEM scratch; the running first-occurrence index
# is carried directly in the (k-invariant) int32 output block.
# ---------------------------------------------------------------------------
def _argmax_kernel(w_ref, idx_ref, max_sc):
    k = pl.program_id(1)

    @pl.when(k == 0)
    def _():
        max_sc[...] = jnp.full_like(max_sc, -jnp.inf)
        idx_ref[...] = jnp.zeros_like(idx_ref)

    w = w_ref[...]                                    # [TO, TKW] f32
    w = jnp.where(jnp.isnan(w), -jnp.inf, w)          # fused protect: NaN never wins
    to, tkw = w.shape
    lane_iota = lax.broadcasted_iota(jnp.int32, (to, tkw), 1)
    blk_max = jnp.max(w, axis=1, keepdims=True)       # [TO, 1]
    # first-occurrence argmax within the block (torch.max tie-break style)
    blk_idx = jnp.min(
        jnp.where(w == blk_max, lane_iota, jnp.int32(tkw)),
        axis=1, keepdims=True) + k * tkw              # global column index

    # strictly-greater keeps the earliest block on ties (first occurrence).
    better = blk_max > max_sc[...]
    idx_ref[...] = jnp.where(better, blk_idx, idx_ref[...])
    max_sc[...] = jnp.where(better, blk_max, max_sc[...])


# ---------------------------------------------------------------------------
# Main kernel: tiled gather-as-matmul   out[b, o] = x[b, idx[o]] * scale
# ---------------------------------------------------------------------------
def _make_gather_kernel(tk: int, scale: float, x_resident: bool):
    def kernel(x_ref, idx_ref, out_ref):
        k = pl.program_id(2)

        @pl.when(k == 0)
        def _():
            out_ref[...] = jnp.zeros_like(out_ref)

        to = idx_ref.shape[0]

        if x_resident:
            # x block is (TB, I_pad), resident across o and k: slice the K chunk.
            koff = pl.multiple_of(k * tk, 128)
            x_blk = x_ref[:, pl.ds(koff, tk)]                       # bf16 [TB, TK]
        else:
            x_blk = x_ref[...]                                      # bf16 [TB, TK]

        # Cheap one-hot: fold the k offset into the (TO,1) idx, compare against
        # a k-invariant lane iota.  bf16 is bit-exact for {0, 1}.
        lane_iota = lax.broadcasted_iota(jnp.int32, (to, tk), 1)
        one_hot = (lane_iota == (idx_ref[...] - k * tk)).astype(jnp.bfloat16)

        # Contract both operands on their lane dim: no transpose, MXU-native.
        out_ref[...] += lax.dot_general(
            x_blk, one_hot,
            dimension_numbers=(((1,), (1,)), ((), ())),
            preferred_element_type=jnp.float32)                     # [TB, TO]

        if scale != 1.0:
            @pl.when(k == pl.num_programs(2) - 1)
            def _():
                out_ref[...] = out_ref[...] * jnp.float32(scale)

    return kernel


def digital_mapper_forward(x, raw_weight, is_out_mapper_in_dspu, shrink_factor,
                           *, tb_max=512, to_max=1024, tk_max=1024, tkw_max=2048):
    """Pallas implementation of DigitalMapper_V2_1.forward (training path).

    NOTE: x is streamed to the MXU as bf16; this is exact only while x stays in
    standard digital range {-1, 0, +1} (the module's documented contract).
    """
    B, I = x.shape
    O, I2 = raw_weight.shape
    assert I == I2

    # ---- tile sizes: lane-dense 128-multiples; TB multiple of 16 (bf16) ----
    TB = min(_round_up(B, 16), _round_up(tb_max, 16))
    TO = min(_round_up(O, 128), _round_up(to_max, 128))
    TK = min(_round_up(I, 128), _round_up(tk_max, 128))
    TKW = min(_round_up(I, 128), _round_up(tkw_max, 128))

    B_pad = _round_up(B, TB)
    O_pad = _round_up(O, TO)
    I_pad = _round_up(I, TK)
    I_pad_w = _round_up(I, TKW)

    # ---- pad to tile multiples ----
    x_p = jnp.pad(x.astype(jnp.bfloat16), ((0, B_pad - B), (0, I_pad - I)))
    w_p = jnp.pad(raw_weight.astype(jnp.float32),
                  ((0, O_pad - O), (0, I_pad_w - I)),
                  constant_values=-jnp.inf)   # padded columns never win argmax

    # ---- prepass: idx[o] = argmax_i raw_weight[o, i]  (K-tiled) ----
    pre_footprint = 2 * TO * TKW * 4 + 2 * TO * 4 + TO * 4
    idx = pl.pallas_call(
        _argmax_kernel,
        out_shape=jax.ShapeDtypeStruct((O_pad, 1), jnp.int32),
        grid=(O_pad // TO, I_pad_w // TKW),
        in_specs=[pl.BlockSpec((TO, TKW), lambda o, k: (o, k))],
        out_specs=pl.BlockSpec((TO, 1), lambda o, k: (o, 0)),
        scratch_shapes=[pltpu.VMEM((TO, 1), jnp.float32)],
        compiler_params=pltpu.CompilerParams(
            dimension_semantics=("parallel", "arbitrary"),
            vmem_limit_bytes=_vmem_limit(pre_footprint)),
    )(w_p)

    # scale is static -> bake into the kernel (multiply elided when 1.0).
    scale = float(shrink_factor) if is_out_mapper_in_dspu else 1.0

    # ---- main kernel: out = (x @ one_hot(idx).T) * scale ----
    # Budget the resident-x plan against a v7x-safe VMEM limit.
    x_res_bytes = 2 * TB * I_pad * 2          # bf16, double-buffered
    out_bytes = 2 * TB * TO * 4               # f32 out block (also the accumulator)
    x_resident = (x_res_bytes + out_bytes) <= _RESIDENT_X_BUDGET

    if x_resident:
        x_spec = pl.BlockSpec((TB, I_pad), lambda b, o, k: (b, 0))
        x_bytes = x_res_bytes
    else:
        # TODO(synk): streamed fallback for very large in_features; implement
        # the scalar-prefetch K-skip here so MXU work stops scaling with I.
        x_spec = pl.BlockSpec((TB, TK), lambda b, o, k: (b, k))
        x_bytes = 2 * TB * TK * 2

    main_footprint = x_bytes + out_bytes + 2 * TO * 4
    kernel = _make_gather_kernel(TK, scale, x_resident)

    out_p = pl.pallas_call(
        kernel,
        out_shape=jax.ShapeDtypeStruct((B_pad, O_pad), jnp.float32),
        grid=(B_pad // TB, O_pad // TO, I_pad // TK),
        in_specs=[
            x_spec,                                               # x (bf16)
            pl.BlockSpec((TO, 1), lambda b, o, k: (o, 0)),        # idx
        ],
        out_specs=pl.BlockSpec((TB, TO), lambda b, o, k: (b, o)),
        compiler_params=pltpu.CompilerParams(
            dimension_semantics=("parallel", "parallel", "arbitrary"),
            vmem_limit_bytes=_vmem_limit(main_footprint)),
    )(x_p, idx)

    return out_p[:B, :O]


if __name__ == "__main__":
    in_features = 30
    out_features = 20
    batch = 8
    is_out_mapper_in_dspu = True
    shrink_factor = 0.98

    key = jax.random.PRNGKey(0)
    k_x, k_w, k_x2, k_w2 = jax.random.split(key, 4)

    # standard +-1 (np style) input, as the module expects
    x = jnp.where(
        jax.random.uniform(k_x, (batch, in_features)) > 0.5, 1.0, -1.0
    ).astype(jnp.float32)

    # __reset_parameters__the_plain_rand01_style: uniform [0, 1)
    raw_weight = jax.random.uniform(
        k_w, (out_features, in_features), dtype=jnp.float32)

    out = digital_mapper_forward(
        x, raw_weight, is_out_mapper_in_dspu, shrink_factor)
    out = jax.block_until_ready(out)

    # pure-JAX reference check of the forward semantics
    idx_ref = jnp.argmax(raw_weight, axis=1)
    ref = x[:, idx_ref] * (shrink_factor if is_out_mapper_in_dspu else 1.0)
    np.testing.assert_allclose(np.asarray(out), np.asarray(ref),
                               rtol=1e-6, atol=1e-6)

    # multi-block coverage: several K blocks in both kernels, 2 O blocks,
    # batch padding, resident-x slicing path.
    B2, I2, O2 = 24, 300, 200
    x2 = jnp.where(
        jax.random.uniform(k_x2, (B2, I2)) > 0.5, 1.0, -1.0
    ).astype(jnp.float32)
    w2 = jax.random.uniform(k_w2, (O2, I2), dtype=jnp.float32)
    out2 = digital_mapper_forward(
        x2, w2, False, shrink_factor,
        tb_max=16, to_max=128, tk_max=128, tkw_max=128)
    out2 = jax.block_until_ready(out2)
    ref2 = x2[:, jnp.argmax(w2, axis=1)]
    np.testing.assert_allclose(np.asarray(out2), np.asarray(ref2),
                               rtol=1e-6, atol=1e-6)

    print("KERNEL_OK")
</pallas_src>

<mosaic_0001>
module attributes {stable_mosaic.version = 11 : i64} {
  func.func @_argmax_kernel(%arg0: i32, %arg1: i32, %arg2: memref<128x128xf32, #tpu.memory_space<vmem>>, %arg3: memref<128x1xi32, #tpu.memory_space<vmem>>, %arg4: memref<128x1xf32, #tpu.memory_space<vmem>>) attributes {dimension_semantics = [#tpu.dimension_semantics<parallel>, #tpu.dimension_semantics<arbitrary>], iteration_bounds = array<i64: 1, 1>, scalar_prefetch = 0 : i64, scratch_operands = 1 : i64, tpu.core_type = #tpu.core_type<tc>, window_params = [{transform_indices = @transform_0, window_bounds = array<i64: 128, 128>}, {transform_indices = @transform_1, window_bounds = array<i64: 128, 1>}]} {
    %c0_i32 = arith.constant 0 : i32
    %0 = arith.cmpi eq, %arg1, %c0_i32 : i32
    %1 = arith.extui %0 : i1 to i32
    %c0_i32_0 = arith.constant 0 : i32
    %2 = arith.cmpi ne, %1, %c0_i32_0 : i32
    scf.if %2 {
      %cst_15 = arith.constant 0xFF800000 : f32
      %27 = vector.broadcast %cst_15 : f32 to vector<128x1xf32>
      %c0_16 = arith.constant 0 : index
      %c0_17 = arith.constant 0 : index
      %28 = vector.load %arg4[%c0_16, %c0_17] : memref<128x1xf32, #tpu.memory_space<vmem>>, vector<128x1xf32>
      tpu.vector_store %arg4[%c0_16, %c0_17], %27 {strides = array<i32>} : memref<128x1xf32, #tpu.memory_space<vmem>>, vector<128x1xf32>,
      %c0_i32_18 = arith.constant 0 : i32
      %29 = vector.broadcast %c0_i32_18 : i32 to vector<128x1xi32>
      %c0_19 = arith.constant 0 : index
      %c0_20 = arith.constant 0 : index
      %30 = vector.load %arg3[%c0_19, %c0_20] : memref<128x1xi32, #tpu.memory_space<vmem>>, vector<128x1xi32>
      tpu.vector_store %arg3[%c0_19, %c0_20], %29 {strides = array<i32>} : memref<128x1xi32, #tpu.memory_space<vmem>>, vector<128x1xi32>,
    } else {
    }
    %c0 = arith.constant 0 : index
    %c0_1 = arith.constant 0 : index
    %3 = vector.load %arg2[%c0, %c0_1] : memref<128x128xf32, #tpu.memory_space<vmem>>, vector<128x128xf32>
    %4 = arith.cmpf one, %3, %3 : vector<128x128xf32>
    %cst = arith.constant 0xFF800000 : f32
    %5 = vector.broadcast %cst : f32 to vector<128x128xf32>
    %6 = arith.select %4, %5, %3 : vector<128x128xi1>, vector<128x128xf32>
    %7 = tpu.iota {dimensions = array<i32: 1>} : vector<128x128xi32>
    %cst_2 = arith.constant dense<0xFF800000> : vector<128xf32>
    %8 = vector.multi_reduction <maximumf>, %6, %cst_2 [1] : vector<128x128xf32> to vector<128xf32>
    %9 = vector.shape_cast %8 : vector<128xf32> to vector<128x1xf32>
    %10 = vector.broadcast %9 : vector<128x1xf32> to vector<128x128xf32>
    %11 = arith.cmpf oeq, %6, %10 : vector<128x128xf32>
    %c128_i32 = arith.constant 128 : i32
    %12 = vector.broadcast %c128_i32 : i32 to vector<128x128xi32>
    %13 = arith.select %11, %7, %12 : vector<128x128xi1>, vector<128x128xi32>
    %cst_3 = arith.constant dense<2147483647> : vector<128xi32>
    %14 = vector.multi_reduction <minsi>, %13, %cst_3 [1] : vector<128x128xi32> to vector<128xi32>
    %15 = vector.shape_cast %14 : vector<128xi32> to vector<128x1xi32>
    %c128_i32_4 = arith.constant 128 : i32
    %16 = arith.muli %arg1, %c128_i32_4 : i32
    %17 = vector.broadcast %16 : i32 to vector<128x1xi32>
    %18 = arith.addi %15, %17 : vector<128x1xi32>
    %c0_5 = arith.constant 0 : index
    %c0_6 = arith.constant 0 : index
    %19 = vector.load %arg4[%c0_5, %c0_6] : memref<128x1xf32, #tpu.memory_space<vmem>>, vector<128x1xf32>
    %20 = arith.cmpf ogt, %9, %19 : vector<128x1xf32>
    %c0_7 = arith.constant 0 : index
    %c0_8 = arith.constant 0 : index
    %21 = vector.load %arg3[%c0_7, %c0_8] : memref<128x1xi32, #tpu.memory_space<vmem>>, vector<128x1xi32>
    %22 = arith.select %20, %18, %21 : vector<128x1xi1>, vector<128x1xi32>
    %c0_9 = arith.constant 0 : index
    %c0_10 = arith.constant 0 : index
    %23 = vector.load %arg3[%c0_9, %c0_10] : memref<128x1xi32, #tpu.memory_space<vmem>>, vector<128x1xi32>
    tpu.vector_store %arg3[%c0_9, %c0_10], %22 {strides = array<i32>} : memref<128x1xi32, #tpu.memory_space<vmem>>, vector<128x1xi32>,
    %c0_11 = arith.constant 0 : index
    %c0_12 = arith.constant 0 : index
    %24 = vector.load %arg4[%c0_11, %c0_12] : memref<128x1xf32, #tpu.memory_space<vmem>>, vector<128x1xf32>
    %25 = arith.select %20, %9, %24 : vector<128x1xi1>, vector<128x1xf32>
    %c0_13 = arith.constant 0 : index
    %c0_14 = arith.constant 0 : index
    %26 = vector.load %arg4[%c0_13, %c0_14] : memref<128x1xf32, #tpu.memory_space<vmem>>, vector<128x1xf32>
    tpu.vector_store %arg4[%c0_13, %c0_14], %25 {strides = array<i32>} : memref<128x1xf32, #tpu.memory_space<vmem>>, vector<128x1xf32>,
    return
  }
  func.func @transform_0(%arg0: i32, %arg1: i32) -> (i32, i32) {
    %c0_i32 = arith.constant 0 : i32
    return %arg0, %arg1 : i32, i32
  }
  func.func @transform_1(%arg0: i32, %arg1: i32) -> (i32, i32) {
    %c0_i32 = arith.constant 0 : i32
    %c0_i32_0 = arith.constant 0 : i32
    return %arg0, %c0_i32 : i32, i32
  }
}

</mosaic_0001>

<bundles_post_ra>
// kernel: tpu_custom_call.1
= control target key start
LH: loop header
LB: loop body
LE: loop exit
PB: predicated region body
PF: predicated region fallthrough
CT: control target
= control target key end

     0   :  { %6 = vsyncpa [#allocation4], 0  ;;  %s576_s6 = smov [#allocation3]   ;;  %s1316_s0 = inlined_call_operand.hbm [shape: f32[128,128], index: 0, kind: input, shape index: {}]   ;;  %s1317_s1 = inlined_call_operand.vmem [shape: s32[128,1], index: 1, kind: output, shape index: {}]  }
   0x1   :  { %s12_s7 = sshll.u32 %s576_s6, 4  ;;  %s13_s7 = int_to_ptr.vmem [resolvable:$true] %s12_s7 }
   0x2   :  { %s562_s8 = scalar_lea.vmem %s13_s7, 2048  ;;  %p567_p1 = scmp.lt.s32.totalorder %s13_s7, %s13_s7 }
   0x3   :  { %p563_p0 = scmp.ne.s32.totalorder %s13_s7, %s562_s8  ;;  %p568_p2 = scmp.lt.s32.totalorder %s562_s8, %s562_s8 }
   0x5   :  { %p569_p3 = por %p568_p2, %p567_p1 }
   0x7   :  { %p570_p4 = pnand %p569_p3, %p563_p0 }
   0x9   :  { %573 = shalt.err (!%p570_p4)
}
   0xa   :  { %s577_s9 = smov 128   ;;  %s578_s10 = smov 8  }
   0xb   :  { %18 = dma.hbm_to_vmem [thread:$0]  %s1316_s0, 2048, %s13_s7, [#allocation4], %s577_s9, %s577_s9, %s578_s10  }
   0xc   :  { %574 = dma.done.wait [#allocation4], 2048  }
   0xd   :  { %575 = vsyncadd [#allocation4], 4294965248  ;;  %vm26_vm0 = vcmask 7168   ;;  %v579_v0 = vmov -inf   ;;  %v59_v1 = vld [vmem:[#allocation3] sm:$0xff]  ;;  %v61_v2 = vld [vmem:[#allocation3 + $0x10] sm:$0xff]  ;;  %v107_v33 = vlaneseq }
   0xe   :  { %27 = vst.msk [vmem:[#allocation2] sm:$0xff] %vm26_vm0, %v579_v0  ;;  %28 = vst.msk [vmem:[#allocation2 + $0x8] sm:$0xff] %vm26_vm0, %v579_v0  ;;  %v60_v3 = vld [vmem:[#allocation3 + $0x8] sm:$0xff]  ;;  %vm75_vm1 = vcmp.ne.f32.partialorder %v59_v1, %v59_v1  ;;  %vm77_vm2 = vcmp.ne.f32.partialorder %v61_v2, %v61_v2  ;;  %v62_v4 = vld [vmem:[#allocation3 + $0x18] sm:$0xff] }
   0xf   :  { %29 = vst.msk [vmem:[#allocation2 + $0x10] sm:$0xff] %vm26_vm0, %v579_v0  ;;  %30 = vst.msk [vmem:[#allocation2 + $0x18] sm:$0xff] %vm26_vm0, %v579_v0  ;;  %vm76_vm3 = vcmp.ne.f32.partialorder %v60_v3, %v60_v3  ;;  %v610_v5 = vsel %vm75_vm1, -inf, %v59_v1  ;;  %v612_v6 = vsel %vm77_vm2, -inf, %v61_v2  ;;  %vm78_vm4 = vcmp.ne.f32.partialorder %v62_v4, %v62_v4  ;;  %v63_v7 = vld [vmem:[#allocation3 + $0x20] sm:$0xff]  ;;  %v64_v8 = vld [vmem:[#allocation3 + $0x28] sm:$0xff] }
  0x10   :  { %31 = vst.msk [vmem:[#allocation2 + $0x20] sm:$0xff] %vm26_vm0, %v579_v0  ;;  %32 = vst.msk [vmem:[#allocation2 + $0x28] sm:$0xff] %vm26_vm0, %v579_v0  ;;  %109 = vmax.xlane.f32.xlu0 %v610_v5  ;;  %113 = vmax.xlane.f32.xlu1 %v612_v6  ;;  %v616_v9 = vsel %vm76_vm3, -inf, %v60_v3  ;;  %v618_v10 = vsel %vm78_vm4, -inf, %v62_v4  ;;  %vm79_vm5 = vcmp.ne.f32.partialorder %v63_v7, %v63_v7  ;;  %v65_v11 = vld [vmem:[#allocation3 + $0x30] sm:$0xff]  ;;  %v66_v12 = vld [vmem:[#allocation3 + $0x38] sm:$0xff] }
  0x11   :  { %33 = vst.msk [vmem:[#allocation2 + $0x30] sm:$0xff] %vm26_vm0, %v579_v0  ;;  %34 = vst.msk [vmem:[#allocation2 + $0x38] sm:$0xff] %vm26_vm0, %v579_v0  ;;  %vm80_vm6 = vcmp.ne.f32.partialorder %v64_v8, %v64_v8  ;;  %v622_v13 = vsel %vm79_vm5, -inf, %v63_v7  ;;  %vm81_vm7 = vcmp.ne.f32.partialorder %v65_v11, %v65_v11  ;;  %vm82_vm8 = vcmp.ne.f32.partialorder %v66_v12, %v66_v12  ;;  %v67_v15 = vld [vmem:[#allocation3 + $0x40] sm:$0xff]  ;;  %v68_v16 = vld [vmem:[#allocation3 + $0x48] sm:$0xff] }
  0x12   :  { %35 = vst.msk [vmem:[#allocation2 + $0x40] sm:$0xff] %vm26_vm0, %v579_v0  ;;  %36 = vst.msk [vmem:[#allocation2 + $0x48] sm:$0xff] %vm26_vm0, %v579_v0  ;;  %v624_v14 = vsel %vm80_vm6, -inf, %v64_v8  ;;  %v628_v17 = vsel %vm81_vm7, -inf, %v65_v11  ;;  %v630_v18 = vsel %vm82_vm8, -inf, %v66_v12  ;;  %vm83_vm9 = vcmp.ne.f32.partialorder %v67_v15, %v67_v15  ;;  %v69_v19 = vld [vmem:[#allocation3 + $0x50] sm:$0xff] }
  0x13   :  { %37 = vst.msk [vmem:[#allocation2 + $0x50] sm:$0xff] %vm26_vm0, %v579_v0  ;;  %38 = vst.msk [vmem:[#allocation2 + $0x58] sm:$0xff] %vm26_vm0, %v579_v0  ;;  %vm84_vm10 = vcmp.ne.f32.partialorder %v68_v16, %v68_v16  ;;  %v70_v20 = vld [vmem:[#allocation3 + $0x58] sm:$0xff]  ;;  %v634_v21 = vsel %vm83_vm9, -inf, %v67_v15  ;;  %vm85_vm11 = vcmp.ne.f32.partialorder %v69_v19, %v69_v19  ;;  %v71_v23 = vld [vmem:[#allocation3 + $0x60] sm:$0xff]  ;;  %v662_v36 = vand.u32 127, %v107_v33 }
  0x14   :  { %39 = vst.msk [vmem:[#allocation2 + $0x60] sm:$0xff] %vm26_vm0, %v579_v0  ;;  %40 = vst.msk [vmem:[#allocation2 + $0x68] sm:$0xff] %vm26_vm0, %v579_v0  ;;  %111 = vmax.xlane.f32.xlu0 %v616_v9  ;;  %115 = vmax.xlane.f32.xlu1 %v618_v10  ;;  %v636_v22 = vsel %vm84_vm10, -inf, %v68_v16  ;;  %vm86_vm12 = vcmp.ne.f32.partialorder %v70_v20, %v70_v20  ;;  %v72_v24 = vld [vmem:[#allocation3 + $0x68] sm:$0xff]  ;;  %v640_v25 = vsel %vm85_vm11, -inf, %v69_v19  ;;  %v73_v27 = vld [vmem:[#allocation3 + $0x70] sm:$0xff] }
  0x15   :  { %41 = vst.msk [vmem:[#allocation2 + $0x70] sm:$0xff] %vm26_vm0, %v579_v0  ;;  %42 = vst.msk [vmem:[#allocation2 + $0x78] sm:$0xff] %vm26_vm0, %v579_v0  ;;  %v642_v26 = vsel %vm86_vm12, -inf, %v70_v20  ;;  %vm87_vm13 = vcmp.ne.f32.partialorder %v71_v23, %v71_v23  ;;  %vm88_vm14 = vcmp.ne.f32.partialorder %v72_v24, %v72_v24  ;;  %v74_v28 = vld [vmem:[#allocation3 + $0x78] sm:$0xff]  ;;  %vm89_vm15 = vcmp.ne.f32.partialorder %v73_v27, %v73_v27  ;;  %v658_v34 = vld [vmem:[#allocation2] sm:$0xff] }
  0x16   :  { %v646_v29 = vsel %vm87_vm13, -inf, %v71_v23  ;;  %v648_v30 = vsel %vm88_vm14, -inf, %v72_v24  ;;  %vm90_vm1 = vcmp.ne.f32.partialorder %v74_v28, %v74_v28  ;;  %v652_v31 = vsel %vm89_vm15, -inf, %v73_v27  ;;  %v660_v35 = vld [vmem:[#allocation2 + $0x10] sm:$0xff]  ;;  %v686_v41 = vld [vmem:[#allocation2 + $0x8] sm:$0xff]  ;;  %v688_v42 = vld [vmem:[#allocation2 + $0x18] sm:$0xff] }
  0x17   :  { %v654_v32 = vsel %vm90_vm1, -inf, %v74_v28  ;;  %v724_v52 = vld [vmem:[#allocation2 + $0x20] sm:$0xff]  ;;  %v726_v53 = vld [vmem:[#allocation2 + $0x28] sm:$0xff] }
  0x18   :  { %117 = vmax.xlane.f32.xlu0 %v622_v13  ;;  %119 = vmax.xlane.f32.xlu1 %v624_v14  ;;  %v765_v0 = vld [vmem:[#allocation2 + $0x30] sm:$0xff]  ;;  %v767_v1 = vld [vmem:[#allocation2 + $0x38] sm:$0xff] }
  0x19   :  { %v807_v12 = vld [vmem:[#allocation2 + $0x40] sm:$0xff] }
  0x1a   :  { %v849_v27 = vld [vmem:[#allocation2 + $0x50] sm:$0xff] }
  0x1b   :  { %1334 = vst [vmem:[#allocation6_spill] sm:$0xff] %v849_v27 }
  0x1c   :  { %121 = vmax.xlane.f32.xlu0 %v628_v17  ;;  %123 = vmax.xlane.f32.xlu1 %v630_v18 }
  0x20   :  { %125 = vmax.xlane.f32.xlu0 %v634_v21  ;;  %127 = vmax.xlane.f32.xlu1 %v636_v22 }
  0x24   :  { %129 = vmax.xlane.f32.xlu0 %v640_v25  ;;  %131 = vmax.xlane.f32.xlu1 %v642_v26 }
  0x28   :  { %133 = vmax.xlane.f32.xlu0 %v646_v29  ;;  %135 = vmax.xlane.f32.xlu1 %v648_v30 }
  0x2c   :  { %137 = vmax.xlane.f32.xlu0 %v652_v31  ;;  %139 = vmax.xlane.f32.xlu1 %v654_v32 }
  0x99   :  { %v664_v37 = vpop.xlane.xlu0 %109  ;;  %v666_v38 = vpop.xlane.xlu1 %113 }
  0x9a   :  { %vm141_vm2 = vcmp.eq.f32.partialorder %v610_v5, %v664_v37  ;;  %vm431_vm3 = vcmp.gt.f32.partialorder %v664_v37, %v658_v34  ;;  %vm143_vm4 = vcmp.eq.f32.partialorder %v612_v6, %v666_v38  ;;  %vm433_vm5 = vcmp.gt.f32.partialorder %v666_v38, %v660_v35 }
  0x9b   :  { %v512_v39 = vsel %vm431_vm3, %v664_v37, %v658_v34  ;;  %v514_v40 = vsel %vm433_vm5, %v666_v38, %v660_v35  ;;  %v691_v43 = vsel %vm141_vm2, %v662_v36, 128  ;;  %v694_v44 = vsel %vm143_vm4, %v662_v36, 128 }
  0x9c   :  { %528 = vst.msk [vmem:[#allocation2] sm:$0xff] %vm26_vm0, %v512_v39  ;;  %530 = vst.msk [vmem:[#allocation2 + $0x10] sm:$0xff] %vm26_vm0, %v514_v40  ;;  %v174_v45 = vshra.s32 %v691_v43, 16  ;;  %v202_v48 = vshra.s32 %v694_v44, 16 }
  0x9d   :  { %v699_v46 = vpop.xlane.xlu0 %111  ;;  %v701_v47 = vpop.xlane.xlu1 %115 }
  0x9e   :  { %vm142_vm6 = vcmp.eq.f32.partialorder %v616_v9, %v699_v46  ;;  %vm432_vm7 = vcmp.gt.f32.partialorder %v699_v46, %v686_v41  ;;  %vm144_vm8 = vcmp.eq.f32.partialorder %v618_v10, %v701_v47  ;;  %vm434_vm9 = vcmp.gt.f32.partialorder %v701_v47, %v688_v42 }
  0x9f   :  { %v513_v49 = vsel %vm432_vm7, %v699_v46, %v686_v41  ;;  %v515_v50 = vsel %vm434_vm9, %v701_v47, %v688_v42  ;;  %v722_v51 = vcvt.s32.f32 %v174_v45  ;;  %v731_v54 = vsel %vm142_vm6, %v662_v36, 128 }
  0xa0   :  { %529 = vst.msk [vmem:[#allocation2 + $0x8] sm:$0xff] %vm26_vm0, %v513_v49  ;;  %531 = vst.msk [vmem:[#allocation2 + $0x18] sm:$0xff] %vm26_vm0, %v515_v50  ;;  %v734_v55 = vsel %vm144_vm8, %v662_v36, 128  ;;  %v741_v58 = vcvt.s32.f32 %v202_v48  ;;  %v188_v59 = vshra.s32 %v731_v54, 16 }
  0xa1   :  { %177 = vmin.xlane.f32.xlu0 %v722_v51  ;;  %v737_v56 = vpop.xlane.xlu0 %117  ;;  %v739_v57 = vpop.xlane.xlu1 %119  ;;  %v216_v60 = vshra.s32 %v734_v55, 16 }
  0xa2   :  { %vm145_vm10 = vcmp.eq.f32.partialorder %v622_v13, %v737_v56  ;;  %vm435_vm11 = vcmp.gt.f32.partialorder %v737_v56, %v724_v52  ;;  %vm146_vm12 = vcmp.eq.f32.partialorder %v624_v14, %v739_v57  ;;  %vm436_vm13 = vcmp.gt.f32.partialorder %v739_v57, %v726_v53  ;;  %v809_v13 = vld [vmem:[#allocation2 + $0x48] sm:$0xff] }
  0xa3   :  { %v516_v61 = vsel %vm435_vm11, %v737_v56, %v724_v52  ;;  %v517_v62 = vsel %vm436_vm13, %v739_v57, %v726_v53  ;;  %v763_v63 = vcvt.s32.f32 %v188_v59  ;;  %v772_v2 = vsel %vm145_vm10, %v662_v36, 128 }
  0xa4   :  { %532 = vst.msk [vmem:[#allocation2 + $0x20] sm:$0xff] %vm26_vm0, %v516_v61  ;;  %533 = vst.msk [vmem:[#allocation2 + $0x28] sm:$0xff] %vm26_vm0, %v517_v62  ;;  %v775_v3 = vsel %vm146_vm12, %v662_v36, 128  ;;  %v783_v6 = vcvt.s32.f32 %v216_v60  ;;  %v230_v7 = vshra.s32 %v772_v2, 16  ;;  %v891_v60 = vld [vmem:[#allocation2 + $0x60] sm:$0xff] }
  0xa5   :  { %205 = vmin.xlane.f32.xlu0 %v741_v58  ;;  %191 = vmin.xlane.f32.xlu1 %v763_v63  ;;  %v779_v4 = vpop.xlane.xlu0 %121  ;;  %v781_v5 = vpop.xlane.xlu1 %123  ;;  %v244_v8 = vshra.s32 %v775_v3, 16  ;;  %1337 = vst [vmem:[#allocation9_spill] sm:$0xff] %v891_v60 }
  0xa6   :  { %vm147_vm14 = vcmp.eq.f32.partialorder %v628_v17, %v779_v4  ;;  %vm437_vm15 = vcmp.gt.f32.partialorder %v779_v4, %v765_v0  ;;  %vm148_vm1 = vcmp.eq.f32.partialorder %v630_v18, %v781_v5  ;;  %vm438_vm2 = vcmp.gt.f32.partialorder %v781_v5, %v767_v1 }
  0xa7   :  { %v518_v9 = vsel %vm437_vm15, %v779_v4, %v765_v0  ;;  %v519_v10 = vsel %vm438_vm2, %v781_v5, %v767_v1  ;;  %v805_v11 = vcvt.s32.f32 %v230_v7  ;;  %v814_v14 = vsel %vm147_vm14, %v662_v36, 128 }
  0xa8   :  { %534 = vst.msk [vmem:[#allocation2 + $0x30] sm:$0xff] %vm26_vm0, %v518_v9  ;;  %535 = vst.msk [vmem:[#allocation2 + $0x38] sm:$0xff] %vm26_vm0, %v519_v10  ;;  %v817_v15 = vsel %vm148_vm1, %v662_v36, 128  ;;  %v825_v18 = vcvt.s32.f32 %v244_v8  ;;  %v258_v19 = vshra.s32 %v814_v14, 16 }
  0xa9   :  { %219 = vmin.xlane.f32.xlu1 %v783_v6  ;;  %233 = vmin.xlane.f32.xlu0 %v805_v11  ;;  %v821_v16 = vpop.xlane.xlu0 %125  ;;  %v823_v17 = vpop.xlane.xlu1 %127  ;;  %v272_v20 = vshra.s32 %v817_v15, 16 }
  0xaa   :  { %vm149_vm4 = vcmp.eq.f32.partialorder %v634_v21, %v821_v16  ;;  %vm439_vm6 = vcmp.gt.f32.partialorder %v821_v16, %v807_v12  ;;  %vm150_vm8 = vcmp.eq.f32.partialorder %v636_v22, %v823_v17  ;;  %vm440_vm10 = vcmp.gt.f32.partialorder %v823_v17, %v809_v13  ;;  %v851_v22 = vld [vmem:[#allocation2 + $0x58] sm:$0xff] }
  0xab   :  { %v520_v23 = vsel %vm439_vm6, %v821_v16, %v807_v12  ;;  %v521_v21 = vsel %vm440_vm10, %v823_v17, %v809_v13  ;;  %v847_v24 = vcvt.s32.f32 %v258_v19  ;;  %1335 = vst [vmem:[#allocation7_spill] sm:$0xff] %v851_v22  ;;  %v856_v28 = vsel %vm149_vm4, %v662_v36, 128 }
  0xac   :  { %536 = vst.msk [vmem:[#allocation2 + $0x40] sm:$0xff] %vm26_vm0, %v520_v23  ;;  %537 = vst.msk [vmem:[#allocation2 + $0x48] sm:$0xff] %vm26_vm0, %v521_v21  ;;  %v859_v33 = vsel %vm150_vm8, %v662_v36, 128  ;;  %v867_v45 = vcvt.s32.f32 %v272_v20  ;;  %v286_v48 = vshra.s32 %v856_v28, 16  ;;  %v933_v21 = vld [vmem:[#allocation2 + $0x70] sm:$0xff] }
  0xad   :  { %247 = vmin.xlane.f32.xlu1 %v825_v18  ;;  %261 = vmin.xlane.f32.xlu0 %v847_v24  ;;  %v863_v39 = vpop.xlane.xlu0 %129  ;;  %v865_v40 = vpop.xlane.xlu1 %131  ;;  %v300_v49 = vshra.s32 %v859_v33, 16  ;;  %1341 = vst [vmem:[#allocation13_spill] sm:$0xff] %v933_v21 }
  0xae   :  { %1336 = vst [vmem:[#allocation8_spill] sm:$0xff] %v865_v40  ;;  %vm151_vm12 = vcmp.eq.f32.partialorder %v640_v25, %v863_v39  ;;  %vm441_vm14 = vcmp.gt.f32.partialorder %v863_v39, %v849_v27  ;;  %vm152_vm1 = vcmp.eq.f32.partialorder %v642_v26, %v865_v40  ;;  %vm1318_vm4 = vcmp.gt.f32.partialorder %v865_v40, %v851_v22  ;;  %v893_v26 = vld [vmem:[#allocation2 + $0x68] sm:$0xff] }
  0xaf   :  { %v522_v50 = vsel %vm441_vm14, %v863_v39, %v849_v27  ;;  %v523_v25 = vsel %vm1318_vm4, %v865_v40, %v851_v22  ;;  %v889_v59 = vcvt.s32.f32 %v286_v48  ;;  %1338 = vst [vmem:[#allocation10_spill] sm:$0xff] %v893_v26  ;;  %v898_v61 = vsel %vm151_vm12, %v662_v36, 128 }
  0xb0   :  { %538 = vst.msk [vmem:[#allocation2 + $0x50] sm:$0xff] %vm26_vm0, %v522_v50  ;;  %539 = vst.msk [vmem:[#allocation2 + $0x58] sm:$0xff] %vm26_vm0, %v523_v25  ;;  %v901_v62 = vsel %vm152_vm1, %v662_v36, 128  ;;  %v909_v9 = vcvt.s32.f32 %v300_v49  ;;  %v314_v10 = vshra.s32 %v898_v61, 16  ;;  %v229_v27 = vand.u32 65535, %v772_v2 }
  0xb1   :  { %275 = vmin.xlane.f32.xlu1 %v867_v45  ;;  %289 = vmin.xlane.f32.xlu0 %v889_v59  ;;  %v905_v7 = vpop.xlane.xlu0 %133  ;;  %v907_v8 = vpop.xlane.xlu1 %135  ;;  %v328_v19 = vshra.s32 %v901_v62, 16  ;;  %v257_v2 = vand.u32 65535, %v814_v14  ;;  %v285_v14 = vand.u32 65535, %v856_v28  ;;  %v313_v28 = vand.u32 65535, %v898_v61 }
  0xb2   :  { %1339 = vst [vmem:[#allocation11_spill] sm:$0xff] %v905_v7  ;;  %1340 = vst [vmem:[#allocation12_spill] sm:$0xff] %v907_v8  ;;  %vm153_vm8 = vcmp.eq.f32.partialorder %v646_v29, %v905_v7  ;;  %vm1320_vm12 = vcmp.gt.f32.partialorder %v905_v7, %v891_v60  ;;  %vm154_vm1 = vcmp.eq.f32.partialorder %v648_v30, %v907_v8  ;;  %v931_v23 = vcvt.s32.f32 %v314_v10  ;;  %v935_v30 = vld [vmem:[#allocation2 + $0x78] sm:$0xff] }
  0xb3   :  { %vm1319_vm4 = vcmp.gt.f32.partialorder %v907_v8, %v893_v26  ;;  %v524_v20 = vsel %vm1320_vm12, %v905_v7, %v891_v60  ;;  %1342 = vst [vmem:[#allocation14_spill] sm:$0xff] %v935_v30  ;;  %v940_v48 = vsel %vm153_vm8, %v662_v36, 128  ;;  %v943_v49 = vsel %vm154_vm1, %v662_v36, 128 }
  0xb4   :  { %v525_v29 = vsel %vm1319_vm4, %v907_v8, %v893_v26  ;;  %540 = vst.msk [vmem:[#allocation2 + $0x60] sm:$0xff] %vm26_vm0, %v524_v20  ;;  %v951_v10 = vcvt.s32.f32 %v328_v19  ;;  %v342_v20 = vshra.s32 %v940_v48, 16  ;;  %v341_v61 = vand.u32 65535, %v940_v48 }
  0xb5   :  { %541 = vst.msk [vmem:[#allocation2 + $0x68] sm:$0xff] %vm26_vm0, %v525_v29  ;;  %303 = vmin.xlane.f32.xlu1 %v909_v9  ;;  %317 = vmin.xlane.f32.xlu0 %v931_v23  ;;  %v947_v50 = vpop.xlane.xlu0 %137  ;;  %v949_v25 = vpop.xlane.xlu1 %139  ;;  %v356_v29 = vshra.s32 %v943_v49, 16 }
  0xb6   :  { %1343 = vst [vmem:[#allocation15_spill] sm:$0xff] %v947_v50  ;;  %1344 = vst [vmem:[#allocation16_spill] sm:$0xff] %v949_v25  ;;  %vm155_vm8 = vcmp.eq.f32.partialorder %v652_v31, %v947_v50  ;;  %vm1333_vm1 = vcmp.gt.f32.partialorder %v947_v50, %v933_v21  ;;  %vm156_vm4 = vcmp.eq.f32.partialorder %v654_v32, %v949_v25  ;;  %v973_v26 = vcvt.s32.f32 %v342_v20 }
  0xb7   :  { %vm1332_vm12 = vcmp.gt.f32.partialorder %v949_v25, %v935_v30  ;;  %v526_v19 = vsel %vm1333_vm1, %v947_v50, %v933_v21  ;;  %v978_v32 = vsel %vm155_vm8, %v662_v36, 128  ;;  %v981_v8 = vsel %vm156_vm4, %v662_v36, 128 }
  0xb8   :  { %v527_v31 = vsel %vm1332_vm12, %v949_v25, %v935_v30  ;;  %542 = vst.msk [vmem:[#allocation2 + $0x70] sm:$0xff] %vm26_vm0, %v526_v19  ;;  %v985_v21 = vcvt.s32.f32 %v356_v29  ;;  %v370_v30 = vshra.s32 %v978_v32, 16  ;;  %v384_v20 = vshra.s32 %v981_v8, 16 }
  0xb9   :  { %543 = vst.msk [vmem:[#allocation2 + $0x78] sm:$0xff] %vm26_vm0, %v527_v31  ;;  %331 = vmin.xlane.f32.xlu1 %v951_v10  ;;  %345 = vmin.xlane.f32.xlu0 %v973_v26  ;;  %v580_v36 = vmov 0   ;;  %v201_v50 = vand.u32 65535, %v694_v44  ;;  %v369_v48 = vand.u32 65535, %v978_v32 }
  0xba   :  { %v989_v25 = vcvt.s32.f32 %v370_v30  ;;  %v993_v19 = vcvt.s32.f32 %v384_v20  ;;  %43 = vst.msk [vmem:[%s1317_s1] sm:$0xff] %vm26_vm0, %v580_v36  ;;  %44 = vst.msk [vmem:[%s1317_s1 + $0x8] sm:$0xff] %vm26_vm0, %v580_v36  ;;  %v173_v30 = vand.u32 65535, %v691_v43  ;;  %v187_v20 = vand.u32 65535, %v731_v54 }
  0xbb   :  { %45 = vst.msk [vmem:[%s1317_s1 + $0x10] sm:$0xff] %vm26_vm0, %v580_v36  ;;  %46 = vst.msk [vmem:[%s1317_s1 + $0x18] sm:$0xff] %vm26_vm0, %v580_v36  ;;  %v215_v43 = vand.u32 65535, %v734_v55  ;;  %v243_v55 = vand.u32 65535, %v775_v3  ;;  %v271_v3 = vand.u32 65535, %v817_v15  ;;  %v299_v15 = vand.u32 65535, %v859_v33 }
  0xbc   :  { %47 = vst.msk [vmem:[%s1317_s1 + $0x20] sm:$0xff] %vm26_vm0, %v580_v36  ;;  %48 = vst.msk [vmem:[%s1317_s1 + $0x28] sm:$0xff] %vm26_vm0, %v580_v36  ;;  %v175_v31 = vcvt.s32.f32 %v173_v30  ;;  %v189_v40 = vcvt.s32.f32 %v187_v20  ;;  %v327_v33 = vand.u32 65535, %v901_v62  ;;  %v355_v62 = vand.u32 65535, %v943_v49 }
  0xbd   :  { %359 = vmin.xlane.f32.xlu1 %v985_v21  ;;  %373 = vmin.xlane.f32.xlu0 %v989_v25  ;;  %49 = vst.msk [vmem:[%s1317_s1 + $0x30] sm:$0xff] %vm26_vm0, %v580_v36  ;;  %50 = vst.msk [vmem:[%s1317_s1 + $0x38] sm:$0xff] %vm26_vm0, %v580_v36  ;;  %v217_v30 = vcvt.s32.f32 %v215_v43  ;;  %v245_v20 = vcvt.s32.f32 %v243_v55  ;;  %v301_v55 = vcvt.s32.f32 %v299_v15  ;;  %v383_v49 = vand.u32 65535, %v981_v8 }
  0xbe   :  { %51 = vst.msk [vmem:[%s1317_s1 + $0x40] sm:$0xff] %vm26_vm0, %v580_v36  ;;  %52 = vst.msk [vmem:[%s1317_s1 + $0x48] sm:$0xff] %vm26_vm0, %v580_v36 }
  0xbf   :  { %53 = vst.msk [vmem:[%s1317_s1 + $0x50] sm:$0xff] %vm26_vm0, %v580_v36  ;;  %54 = vst.msk [vmem:[%s1317_s1 + $0x58] sm:$0xff] %vm26_vm0, %v580_v36 }
  0xc0   :  { %55 = vst.msk [vmem:[%s1317_s1 + $0x60] sm:$0xff] %vm26_vm0, %v580_v36  ;;  %56 = vst.msk [vmem:[%s1317_s1 + $0x68] sm:$0xff] %vm26_vm0, %v580_v36 }
  0xc1   :  { %387 = vmin.xlane.f32.xlu1 %v993_v19  ;;  %57 = vst.msk [vmem:[%s1317_s1 + $0x70] sm:$0xff] %vm26_vm0, %v580_v36  ;;  %58 = vst.msk [vmem:[%s1317_s1 + $0x78] sm:$0xff] %vm26_vm0, %v580_v36  ;;  %v203_v36 = vcvt.s32.f32 %v201_v50  ;;  %v231_v50 = vcvt.s32.f32 %v229_v27  ;;  %v259_v27 = vcvt.s32.f32 %v257_v2  ;;  %v315_v2 = vcvt.s32.f32 %v313_v28 }
  0xc2   :  { %v450_v41 = vld [vmem:[%s1317_s1 + $0x18] sm:$0xff] }
  0xc3   :  { %v451_v35 = vld [vmem:[%s1317_s1 + $0x20] sm:$0xff]  ;;  %v452_v42 = vld [vmem:[%s1317_s1 + $0x28] sm:$0xff] }
  0xc4   :  { %v453_v47 = vld [vmem:[%s1317_s1 + $0x30] sm:$0xff]  ;;  %v454_v53 = vld [vmem:[%s1317_s1 + $0x38] sm:$0xff] }
  0xc5   :  { %v455_v57 = vld [vmem:[%s1317_s1 + $0x40] sm:$0xff]  ;;  %v456_v1 = vld [vmem:[%s1317_s1 + $0x48] sm:$0xff] }
  0xc6   :  { %v457_v5 = vld [vmem:[%s1317_s1 + $0x50] sm:$0xff]  ;;  %v458_v13 = vld [vmem:[%s1317_s1 + $0x58] sm:$0xff] }
  0xc7   :  { %v459_v17 = vld [vmem:[%s1317_s1 + $0x60] sm:$0xff] }
 0x12a   :  { %v1061_v29 = vpop.xlane.xlu0 %177 }
 0x12b   :  { %vm179_vm4 = vcmp.eq.f32.partialorder %v722_v51, %v1061_v29  ;;  %v184_v8 = vcvt.f32.s32 %v1061_v29 }
 0x12c   :  { %v180_v60 = vsel %vm179_vm4, %v175_v31, inf }
 0x12d   :  { %181 = vmin.xlane.f32.xlu0 %v180_v60  ;;  %v185_v28 = vshll.u32 %v184_v8, 16 }
 0x12e   :  { %v1067_v7 = vpop.xlane.xlu1 %191  ;;  %v1069_v22 = vpop.xlane.xlu0 %205 }
 0x12f   :  { %vm193_vm8 = vcmp.eq.f32.partialorder %v763_v63, %v1067_v7  ;;  %vm207_vm12 = vcmp.eq.f32.partialorder %v741_v58, %v1069_v22  ;;  %v198_v15 = vcvt.f32.s32 %v1067_v7 }
 0x130   :  { %v194_v44 = vsel %vm193_vm8, %v189_v40, inf  ;;  %v208_v51 = vsel %vm207_vm12, %v203_v36, inf }
 0x131   :  { %195 = vmin.xlane.f32.xlu1 %v194_v44  ;;  %209 = vmin.xlane.f32.xlu0 %v208_v51  ;;  %v273_v44 = vcvt.s32.f32 %v271_v3  ;;  %v287_v51 = vcvt.s32.f32 %v285_v14 }
 0x132   :  { %v1077_v54 = vpop.xlane.xlu1 %219  ;;  %v1079_v60 = vpop.xlane.xlu0 %233 }
 0x133   :  { %vm221_vm4 = vcmp.eq.f32.partialorder %v783_v6, %v1077_v54  ;;  %vm235_vm1 = vcmp.eq.f32.partialorder %v805_v11, %v1079_v60 }
 0x134   :  { %v222_v58 = vsel %vm221_vm4, %v217_v30, inf  ;;  %v236_v63 = vsel %vm235_vm1, %v231_v50, inf }
 0x135   :  { %223 = vmin.xlane.f32.xlu1 %v222_v58  ;;  %237 = vmin.xlane.f32.xlu0 %v236_v63 }
 0x136   :  { %v1087_v40 = vpop.xlane.xlu1 %247  ;;  %v1089_v31 = vpop.xlane.xlu0 %261 }
 0x137   :  { %vm249_vm12 = vcmp.eq.f32.partialorder %v825_v18, %v1087_v40  ;;  %vm263_vm8 = vcmp.eq.f32.partialorder %v847_v24, %v1089_v31  ;;  %v254_v37 = vcvt.f32.s32 %v1087_v40 }
 0x138   :  { %v250_v6 = vsel %vm249_vm12, %v245_v20, inf  ;;  %v264_v11 = vsel %vm263_vm8, %v259_v27, inf  ;;  %v329_v20 = vcvt.s32.f32 %v327_v33  ;;  %v343_v27 = vcvt.s32.f32 %v341_v61 }
 0x139   :  { %251 = vmin.xlane.f32.xlu1 %v250_v6  ;;  %265 = vmin.xlane.f32.xlu0 %v264_v11  ;;  %v357_v6 = vcvt.s32.f32 %v355_v62  ;;  %v371_v11 = vcvt.s32.f32 %v369_v48  ;;  %v226_v33 = vcvt.f32.s32 %v1077_v54  ;;  %v448_v54 = vld [vmem:[%s1317_s1 + $0x8] sm:$0xff]  ;;  %v268_v48 = vcvt.f32.s32 %v1089_v31 }
 0x13a   :  { %v1097_v36 = vpop.xlane.xlu1 %275  ;;  %v1099_v43 = vpop.xlane.xlu0 %289  ;;  %v255_v40 = vshll.u32 %v254_v37, 16 }
 0x13b   :  { %vm277_vm1 = vcmp.eq.f32.partialorder %v867_v45, %v1097_v36  ;;  %vm291_vm4 = vcmp.eq.f32.partialorder %v889_v59, %v1099_v43  ;;  %v227_v62 = vshll.u32 %v226_v33, 16  ;;  %v269_v31 = vshll.u32 %v268_v48, 16 }
 0x13c   :  { %v278_v18 = vsel %vm277_vm1, %v273_v44, inf  ;;  %v292_v24 = vsel %vm291_vm4, %v287_v51, inf  ;;  %v385_v44 = vcvt.s32.f32 %v383_v49 }
 0x13d   :  { %279 = vmin.xlane.f32.xlu1 %v278_v18  ;;  %293 = vmin.xlane.f32.xlu0 %v292_v24  ;;  %v447_v24 = vld [vmem:[%s1317_s1] sm:$0xff] }
 0x13e   :  { %v1107_v30 = vpop.xlane.xlu1 %303  ;;  %v1109_v50 = vpop.xlane.xlu0 %317 }
 0x13f   :  { %vm305_vm12 = vcmp.eq.f32.partialorder %v909_v9, %v1107_v30  ;;  %vm319_vm8 = vcmp.eq.f32.partialorder %v931_v23, %v1109_v50 }
 0x140   :  { %v306_v45 = vsel %vm305_vm12, %v301_v55, inf  ;;  %v320_v59 = vsel %vm319_vm8, %v315_v2, inf  ;;  %v199_v2 = vshll.u32 %v198_v15, 16 }
 0x141   :  { %307 = vmin.xlane.f32.xlu1 %v306_v45  ;;  %321 = vmin.xlane.f32.xlu0 %v320_v59 }
 0x142   :  { %v1117_v58 = vpop.xlane.xlu1 %331  ;;  %v1119_v63 = vpop.xlane.xlu0 %345 }
 0x143   :  { %vm333_vm1 = vcmp.eq.f32.partialorder %v951_v10, %v1117_v58  ;;  %vm347_vm4 = vcmp.eq.f32.partialorder %v973_v26, %v1119_v63 }
 0x144   :  { %v334_v9 = vsel %vm333_vm1, %v329_v20, inf  ;;  %v348_v23 = vsel %vm347_vm4, %v343_v27, inf }
 0x145   :  { %335 = vmin.xlane.f32.xlu1 %v334_v9  ;;  %349 = vmin.xlane.f32.xlu0 %v348_v23 }
 0x146   :  { %v1127_v3 = vpop.xlane.xlu1 %359  ;;  %v1129_v14 = vpop.xlane.xlu0 %373 }
 0x147   :  { %vm361_vm12 = vcmp.eq.f32.partialorder %v985_v21, %v1127_v3  ;;  %vm375_vm8 = vcmp.eq.f32.partialorder %v989_v25, %v1129_v14  ;;  %v212_v25 = vcvt.f32.s32 %v1069_v22 }
 0x148   :  { %v362_v10 = vsel %vm361_vm12, %v357_v6, inf  ;;  %v376_v26 = vsel %vm375_vm8, %v371_v11, inf }
 0x149   :  { %363 = vmin.xlane.f32.xlu1 %v362_v10  ;;  %377 = vmin.xlane.f32.xlu0 %v376_v26  ;;  %v213_v29 = vshll.u32 %v212_v25, 16  ;;  %v282_v26 = vcvt.f32.s32 %v1097_v36 }
 0x14a   :  { %v1136_v32 = vpop.xlane.xlu1 %387 }
 0x14b   :  { %vm389_vm1 = vcmp.eq.f32.partialorder %v993_v19, %v1136_v32  ;;  %v240_v19 = vcvt.f32.s32 %v1079_v60  ;;  %v449_v60 = vld [vmem:[%s1317_s1 + $0x10] sm:$0xff]  ;;  %v283_v36 = vshll.u32 %v282_v26, 16  ;;  %v1349_v26 = vld [vmem:[#allocation11_spill] sm:$0xff] }
 0x14c   :  { %v390_v51 = vsel %vm389_vm1, %v385_v44, inf  ;;  %v296_v44 = vcvt.f32.s32 %v1099_v43 }
 0x14d   :  { %391 = vmin.xlane.f32.xlu1 %v390_v51  ;;  %v241_v34 = vshll.u32 %v240_v19, 16 }
 0x14e   :  { %v297_v43 = vshll.u32 %v296_v44, 16  ;;  %v1350_v44 = vld [vmem:[#allocation9_spill] sm:$0xff] }
 0x1b6   :  { %v182_v21 = vpop.xlane.xlu0 %181 }
 0x1b7   :  { %v183_v18 = vcvt.f32.s32 %v182_v21 }
 0x1b9   :  { %v186_v55 = vadd.s32 %v185_v28, %v183_v18  ;;  %v310_v18 = vcvt.f32.s32 %v1107_v30 }
 0x1ba   :  { %v196_v61 = vpop.xlane.xlu1 %195  ;;  %v210_v45 = vpop.xlane.xlu0 %209 }
 0x1bb   :  { %v463_v7 = vsel %vm431_vm3, %v186_v55, %v447_v24  ;;  %v197_v59 = vcvt.f32.s32 %v196_v61  ;;  %v211_v22 = vcvt.f32.s32 %v210_v45  ;;  %v324_v24 = vcvt.f32.s32 %v1109_v50 }
 0x1bc   :  { %480 = vst.msk [vmem:[%s1317_s1] sm:$0xff] %vm26_vm0, %v463_v7  ;;  %v311_v30 = vshll.u32 %v310_v18, 16  ;;  %v352_v7 = vcvt.f32.s32 %v1119_v63  ;;  %v1356_v18 = vld [vmem:[#allocation13_spill] sm:$0xff] }
 0x1bd   :  { %v200_v20 = vadd.s32 %v199_v2, %v197_v59  ;;  %v214_v27 = vadd.s32 %v213_v29, %v211_v22  ;;  %v325_v50 = vshll.u32 %v324_v24, 16  ;;  %v338_v29 = vcvt.f32.s32 %v1117_v58 }
 0x1be   :  { %v224_v9 = vpop.xlane.xlu1 %223  ;;  %v238_v23 = vpop.xlane.xlu0 %237  ;;  %v353_v63 = vshll.u32 %v352_v7, 16 }
 0x1bf   :  { %v464_v6 = vsel %vm432_vm7, %v200_v20, %v448_v54  ;;  %v465_v11 = vsel %vm433_vm5, %v214_v27, %v449_v60  ;;  %v225_v49 = vcvt.f32.s32 %v224_v9  ;;  %v239_v10 = vcvt.f32.s32 %v238_v23 }
 0x1c0   :  { %481 = vst.msk [vmem:[%s1317_s1 + $0x8] sm:$0xff] %vm26_vm0, %v464_v6  ;;  %482 = vst.msk [vmem:[%s1317_s1 + $0x10] sm:$0xff] %vm26_vm0, %v465_v11  ;;  %v339_v58 = vshll.u32 %v338_v29, 16  ;;  %vm1351_vm5 = vcmp.gt.f32.partialorder %v1349_v26, %v1350_v44 }
 0x1c1   :  { %v228_v38 = vadd.s32 %v227_v62, %v225_v49  ;;  %v242_v46 = vadd.s32 %v241_v34, %v239_v10  ;;  %v366_v62 = vcvt.f32.s32 %v1127_v3  ;;  %v380_v34 = vcvt.f32.s32 %v1129_v14 }
 0x1c2   :  { %v252_v51 = vpop.xlane.xlu1 %251  ;;  %v266_v8 = vpop.xlane.xlu0 %265 }
 0x1c3   :  { %v466_v15 = vsel %vm434_vm9, %v228_v38, %v450_v41  ;;  %v467_v21 = vsel %vm435_vm11, %v242_v46, %v451_v35  ;;  %v253_v28 = vcvt.f32.s32 %v252_v51  ;;  %v267_v25 = vcvt.f32.s32 %v266_v8  ;;  %v1346_v46 = vld [vmem:[#allocation8_spill] sm:$0xff] }
 0x1c4   :  { %483 = vst.msk [vmem:[%s1317_s1 + $0x18] sm:$0xff] %vm26_vm0, %v466_v15  ;;  %484 = vst.msk [vmem:[%s1317_s1 + $0x20] sm:$0xff] %vm26_vm0, %v467_v21  ;;  %v367_v14 = vshll.u32 %v366_v62, 16  ;;  %v381_v10 = vshll.u32 %v380_v34, 16  ;;  %v394_v41 = vcvt.f32.s32 %v1136_v32  ;;  %v460_v32 = vld [vmem:[%s1317_s1 + $0x68] sm:$0xff]  ;;  %v461_v21 = vld [vmem:[%s1317_s1 + $0x70] sm:$0xff] }
 0x1c5   :  { %v256_v52 = vadd.s32 %v255_v40, %v253_v28  ;;  %v270_v56 = vadd.s32 %v269_v31, %v267_v25  ;;  %v1347_v40 = vld [vmem:[#allocation7_spill] sm:$0xff] }
 0x1c6   :  { %v280_v55 = vpop.xlane.xlu1 %279  ;;  %v294_v2 = vpop.xlane.xlu0 %293  ;;  %vm1348_vm3 = vcmp.gt.f32.partialorder %v1346_v46, %v1347_v40 }
 0x1c7   :  { %v468_v33 = vsel %vm436_vm13, %v256_v52, %v452_v42  ;;  %v469_v19 = vsel %vm437_vm15, %v270_v56, %v453_v47  ;;  %v281_v61 = vcvt.f32.s32 %v280_v55  ;;  %v295_v45 = vcvt.f32.s32 %v294_v2  ;;  %v1352_v52 = vld [vmem:[#allocation12_spill] sm:$0xff]  ;;  %v1353_v56 = vld [vmem:[#allocation10_spill] sm:$0xff]  ;;  %v462_v2 = vld [vmem:[%s1317_s1 + $0x78] sm:$0xff] }
 0x1c8   :  { %485 = vst.msk [vmem:[%s1317_s1 + $0x28] sm:$0xff] %vm26_vm0, %v468_v33  ;;  %486 = vst.msk [vmem:[%s1317_s1 + $0x30] sm:$0xff] %vm26_vm0, %v469_v19  ;;  %v395_v47 = vshll.u32 %v394_v41, 16  ;;  %vm1354_vm7 = vcmp.gt.f32.partialorder %v1352_v52, %v1353_v56  ;;  %v1358_v19 = vld [vmem:[#allocation16_spill] sm:$0xff] }
 0x1c9   :  { %v284_v0 = vadd.s32 %v283_v36, %v281_v61  ;;  %v298_v4 = vadd.s32 %v297_v43, %v295_v45  ;;  %v1355_v43 = vld [vmem:[#allocation15_spill] sm:$0xff]  ;;  %v1359_v61 = vld [vmem:[#allocation14_spill] sm:$0xff] }
 0x1ca   :  { %v308_v59 = vpop.xlane.xlu1 %307  ;;  %v322_v22 = vpop.xlane.xlu0 %321  ;;  %vm1357_vm9 = vcmp.gt.f32.partialorder %v1355_v43, %v1356_v18  ;;  %vm1360_vm11 = vcmp.gt.f32.partialorder %v1358_v19, %v1359_v61 }
 0x1cb   :  { %v470_v54 = vsel %vm438_vm2, %v284_v0, %v454_v53  ;;  %v471_v60 = vsel %vm439_vm6, %v298_v4, %v455_v57  ;;  %v309_v20 = vcvt.f32.s32 %v308_v59  ;;  %v323_v27 = vcvt.f32.s32 %v322_v22 }
 0x1cc   :  { %487 = vst.msk [vmem:[%s1317_s1 + $0x38] sm:$0xff] %vm26_vm0, %v470_v54  ;;  %488 = vst.msk [vmem:[%s1317_s1 + $0x40] sm:$0xff] %vm26_vm0, %v471_v60 }
 0x1cd   :  { %v312_v12 = vadd.s32 %v311_v30, %v309_v20  ;;  %v326_v16 = vadd.s32 %v325_v50, %v323_v27 }
 0x1ce   :  { %v336_v37 = vpop.xlane.xlu1 %335  ;;  %v350_v48 = vpop.xlane.xlu0 %349 }
 0x1cf   :  { %v472_v9 = vsel %vm440_vm10, %v312_v12, %v456_v1  ;;  %v473_v6 = vsel %vm441_vm14, %v326_v16, %v457_v5  ;;  %v337_v11 = vcvt.f32.s32 %v336_v37  ;;  %v351_v49 = vcvt.f32.s32 %v350_v48 }
 0x1d0   :  { %489 = vst.msk [vmem:[%s1317_s1 + $0x48] sm:$0xff] %vm26_vm0, %v472_v9  ;;  %490 = vst.msk [vmem:[%s1317_s1 + $0x50] sm:$0xff] %vm26_vm0, %v473_v6 }
 0x1d1   :  { %v340_v39 = vadd.s32 %v339_v58, %v337_v11  ;;  %v354_v3 = vadd.s32 %v353_v63, %v351_v49 }
 0x1d2   :  { %v364_v35 = vpop.xlane.xlu1 %363  ;;  %v378_v38 = vpop.xlane.xlu0 %377 }
 0x1d3   :  { %v474_v31 = vsel %vm1348_vm3, %v340_v39, %v458_v13  ;;  %v475_v51 = vsel %vm1351_vm5, %v354_v3, %v459_v17  ;;  %v365_v8 = vcvt.f32.s32 %v364_v35  ;;  %v379_v15 = vcvt.f32.s32 %v378_v38 }
 0x1d4   :  { %491 = vst.msk [vmem:[%s1317_s1 + $0x58] sm:$0xff] %vm26_vm0, %v474_v31  ;;  %492 = vst.msk [vmem:[%s1317_s1 + $0x60] sm:$0xff] %vm26_vm0, %v475_v51 }
 0x1d5   :  { %v368_v28 = vadd.s32 %v367_v14, %v365_v8  ;;  %v382_v25 = vadd.s32 %v381_v10, %v379_v15 }
 0x1d6   :  { %v392_v42 = vpop.xlane.xlu1 %391 }
 0x1d7   :  { %v476_v36 = vsel %vm1354_vm7, %v368_v28, %v460_v32  ;;  %v477_v24 = vsel %vm1357_vm9, %v382_v25, %v461_v21  ;;  %v393_v55 = vcvt.f32.s32 %v392_v42 }
 0x1d8   :  { %493 = vst.msk [vmem:[%s1317_s1 + $0x68] sm:$0xff] %vm26_vm0, %v476_v36  ;;  %494 = vst.msk [vmem:[%s1317_s1 + $0x70] sm:$0xff] %vm26_vm0, %v477_v24 }
 0x1d9   :  { %v396_v33 = vadd.s32 %v395_v47, %v393_v55 }
 0x1db   :  { %v478_v45 = vsel %vm1360_vm11, %v396_v33, %v462_v2 }
 0x1dc   :  { %495 = vst.msk [vmem:[%s1317_s1 + $0x78] sm:$0xff] %vm26_vm0, %v478_v45 }
 0x1dd   :  { %548 = vsyncpa [#allocation4], 1 }

</bundles_post_ra>
